<compile_context>
chip_gen: v6e
topology: v6e:2x2x1
jax: 0.10.0
libtpu: 0.0.40
codegen_flags: <defaults>
</compile_context>

<pallas_src>
import functools

import jax
import jax.numpy as jnp
from jax import lax
from jax.experimental import pallas as pl
from jax.experimental.pallas import tpu as pltpu


def _se_kernel(x_ref, w1t_ref, b1_ref, w2t_ref, b2_ref, o_ref, *,
               hw_true: int, chunk: int):
    """Fused SE for one batch tile.

    x_ref:   (TB, C, HWp)  activations (HWp = HW padded to a multiple of 128)
    w1t_ref: (C, Cr)       fc1 weight, pre-transposed in the wrapper
    b1_ref:  (1, Cr)
    w2t_ref: (Cr, C)       fc2 weight, pre-transposed in the wrapper
    b2_ref:  (1, C)
    o_ref:   (TB, C, HWp)
    """
    tb, c, hwp = x_ref.shape
    n_chunks = hwp // chunk
    unroll = True if n_chunks <= 8 else False

    # --- squeeze: global average pool, streamed over HW chunks (f32 accum) ---
    def pool_body(i, acc):
        off = pl.multiple_of(i * chunk, 128)
        xi = x_ref[:, :, pl.ds(off, chunk)].astype(jnp.float32)
        return acc + jnp.sum(xi, axis=-1)

    s = lax.fori_loop(0, n_chunks, pool_body,
                      jnp.zeros((tb, c), jnp.float32), unroll=unroll)
    y = s * jnp.float32(1.0 / hw_true)                         # (TB, C)

    # --- excitation: fc1 + ReLU, fc2 + HSigmoid (relu6(z+3)/6) ---
    h = jnp.dot(y, w1t_ref[...], preferred_element_type=jnp.float32)
    h = jnp.maximum(h + b1_ref[...], 0.0)                      # (TB, Cr)
    z = jnp.dot(h, w2t_ref[...], preferred_element_type=jnp.float32)
    z = z + b2_ref[...]                                        # (TB, C)
    gate = jnp.clip(z + 3.0, 0.0, 6.0) * jnp.float32(1.0 / 6.0)
    gate = gate[..., None]                                     # (TB, C, 1)

    # --- scale: re-read x chunk-by-chunk so the tile never sits in vregs ---
    def scale_body(i, carry):
        off = pl.multiple_of(i * chunk, 128)
        xi = x_ref[:, :, pl.ds(off, chunk)].astype(jnp.float32)
        o_ref[:, :, pl.ds(off, chunk)] = (xi * gate).astype(o_ref.dtype)
        return carry

    lax.fori_loop(0, n_chunks, scale_body, 0, unroll=unroll)


def _round_up(x, m):
    return (x + m - 1) // m * m


@jax.jit
def se_module(x, w1, b1, w2, b2):
    """SEModule forward. x: (B, C, H, W). Returns (B, C, H, W)."""
    B, C, H, W = x.shape
    Cr = w1.shape[0]
    HW = H * W
    itemsize = jnp.dtype(x.dtype).itemsize

    # Lane-dense spatial axis: pad HW to a multiple of 128. Zero padding does
    # not affect the pooled sum (we divide by the true HW inside the kernel),
    # and the padded region is sliced off afterwards.
    HWp = _round_up(HW, 128)

    # Batch tile: as many batch rows per grid step as fit a conservative VMEM
    # budget (input + output, double-buffered).
    VMEM_BUDGET = 40 * 1024 * 1024          # conservative across v5e/v6e/v7x
    per_batch = 4 * C * HWp * itemsize      # 2 operands x 2 pipeline buffers
    TB = int(max(1, min(B, VMEM_BUDGET // max(per_batch, 1))))
    # TODO(synk): if a single batch row (C*HWp) exceeds the VMEM budget, add an
    # HW grid axis ("arbitrary") with a pool-accumulate pass then a scale pass.
    Bp = _round_up(B, TB)

    x_flat = x.reshape(B, C, HW)
    if HWp != HW:
        x_flat = jnp.pad(x_flat, ((0, 0), (0, 0), (0, HWp - HW)))
    if Bp != B:
        x_flat = jnp.pad(x_flat, ((0, Bp - B), (0, 0), (0, 0)))

    # Pre-transpose loop-invariant weights in the wrapper (no per-step XLU work).
    w1t = jnp.asarray(w1, jnp.float32).T            # (C, Cr)
    w2t = jnp.asarray(w2, jnp.float32).T            # (Cr, C)
    b1_2d = jnp.asarray(b1, jnp.float32).reshape(1, Cr)
    b2_2d = jnp.asarray(b2, jnp.float32).reshape(1, C)

    # Streaming chunk along HW: largest of {512, 256, 128} dividing HWp.
    chunk = 512
    while HWp % chunk != 0:
        chunk //= 2

    kernel = functools.partial(_se_kernel, hw_true=HW, chunk=chunk)

    out_flat = pl.pallas_call(
        kernel,
        out_shape=jax.ShapeDtypeStruct((Bp, C, HWp), x.dtype),
        grid_spec=pltpu.PrefetchScalarGridSpec(
            num_scalar_prefetch=0,
            grid=(Bp // TB,),
            in_specs=[
                pl.BlockSpec((TB, C, HWp), lambda b: (b, 0, 0)),
                pl.BlockSpec((C, Cr), lambda b: (0, 0)),
                pl.BlockSpec((1, Cr), lambda b: (0, 0)),
                pl.BlockSpec((Cr, C), lambda b: (0, 0)),
                pl.BlockSpec((1, C), lambda b: (0, 0)),
            ],
            out_specs=pl.BlockSpec((TB, C, HWp), lambda b: (b, 0, 0)),
        ),
        # Elementwise rescale of x -> alias input 0 to output 0 (halves the
        # HBM footprint; traffic is unchanged).
        input_output_aliases={0: 0},
        compiler_params=pltpu.CompilerParams(
            dimension_semantics=("parallel",),
            vmem_limit_bytes=48 * 1024 * 1024,      # headroom under v7x 64 MiB
        ),
    )(x_flat, w1t, b1_2d, w2t, b2_2d)

    out_flat = out_flat[:B, :, :HW]
    return out_flat.reshape(B, C, H, W)


def se_reference(x, w1, b1, w2, b2):
    """Pure-JAX reference matching the PyTorch forward."""
    y = jnp.mean(x, axis=(2, 3))                    # (B, C)
    h = jnp.maximum(y @ w1.T + b1, 0.0)             # (B, Cr)
    z = h @ w2.T + b2                               # (B, C)
    gate = jnp.clip(z + 3.0, 0.0, 6.0) / 6.0
    return x * gate[:, :, None, None]


if __name__ == "__main__":
    # Small shapes consistent with SEModule(channel=8, reduction=4)
    B, C, H, W = 2, 8, 16, 16
    reduction = 4
    Cr = C // reduction

    key = jax.random.PRNGKey(0)
    kx, kw1, kb1, kw2, kb2 = jax.random.split(key, 5)

    x = jax.random.normal(kx, (B, C, H, W), dtype=jnp.float32)
    # Conv2d(channel, channel//reduction, 1) weight -> (Cr, C) after squeeze
    w1 = jax.random.normal(kw1, (Cr, C), dtype=jnp.float32) * 0.1
    b1 = jax.random.normal(kb1, (Cr,), dtype=jnp.float32) * 0.1
    # Conv2d(channel//reduction, channel, 1) weight -> (C, Cr)
    w2 = jax.random.normal(kw2, (C, Cr), dtype=jnp.float32) * 0.1
    b2 = jax.random.normal(kb2, (C,), dtype=jnp.float32) * 0.1

    out = se_module(x, w1, b1, w2, b2)
    jax.block_until_ready(out)

    ref = se_reference(x, w1, b1, w2, b2)
    assert out.shape == (B, C, H, W)
    assert jnp.allclose(out, ref, atol=1e-5, rtol=1e-5), "mismatch vs reference"

    print("KERNEL_OK")
</pallas_src>

<mosaic_0001>
module attributes {stable_mosaic.version = 11 : i64} {
  func.func @_se_kernel(%arg0: i32, %arg1: memref<2x8x256xf32, #tpu.memory_space<vmem>>, %arg2: memref<8x2xf32, #tpu.memory_space<vmem>>, %arg3: memref<1x2xf32, #tpu.memory_space<vmem>>, %arg4: memref<2x8xf32, #tpu.memory_space<vmem>>, %arg5: memref<1x8xf32, #tpu.memory_space<vmem>>, %arg6: memref<2x8x256xf32, #tpu.memory_space<vmem>>) attributes {dimension_semantics = [#tpu.dimension_semantics<parallel>], iteration_bounds = array<i64: 1>, scalar_prefetch = 0 : i64, scratch_operands = 0 : i64, tpu.core_type = #tpu.core_type<tc>, window_params = [{transform_indices = @transform_0, window_bounds = array<i64: 2, 8, 256>}, {pipeline_mode = #tpu.pipeline_mode<synchronous>, transform_indices = @transform_1, window_bounds = array<i64: 8, 2>}, {pipeline_mode = #tpu.pipeline_mode<synchronous>, transform_indices = @transform_2, window_bounds = array<i64: 1, 2>}, {pipeline_mode = #tpu.pipeline_mode<synchronous>, transform_indices = @transform_3, window_bounds = array<i64: 2, 8>}, {pipeline_mode = #tpu.pipeline_mode<synchronous>, transform_indices = @transform_4, window_bounds = array<i64: 1, 8>}, {transform_indices = @transform_5, window_bounds = array<i64: 2, 8, 256>}]} {
    %cst = arith.constant 0.000000e+00 : f32
    %0 = vector.broadcast %cst : f32 to vector<2x8xf32>
    %c0_i32 = arith.constant 0 : i32
    %c256_i32 = arith.constant 256 : i32
    %1 = arith.muli %c0_i32, %c256_i32 : i32
    %2 = tpu.assume_multiple %1, 128 : i32
    %c0 = arith.constant 0 : index
    %c0_0 = arith.constant 0 : index
    %3 = arith.index_cast %2 : i32 to index
    %4 = vector.load %arg1[%c0, %c0_0, %3] : memref<2x8x256xf32, #tpu.memory_space<vmem>>, vector<2x8x256xf32>
    %cst_1 = arith.constant dense<0.000000e+00> : vector<2x8xf32>
    %5 = vector.multi_reduction <add>, %4, %cst_1 [2] : vector<2x8x256xf32> to vector<2x8xf32>
    %6 = arith.addf %0, %5 : vector<2x8xf32>
    %c1_i32 = arith.constant 1 : i32
    %cst_2 = arith.constant 3.906250e-03 : f32
    %7 = vector.broadcast %cst_2 : f32 to vector<2x8xf32>
    %8 = arith.mulf %6, %7 : vector<2x8xf32>
    %c0_3 = arith.constant 0 : index
    %c0_4 = arith.constant 0 : index
    %9 = vector.load %arg2[%c0_3, %c0_4] : memref<8x2xf32, #tpu.memory_space<vmem>>, vector<8x2xf32>
    %cst_5 = arith.constant dense<0.000000e+00> : vector<2x2xf32>
    %10 = tpu.matmul %8, %9, %cst_5 {dimension_numbers = #tpu.dot_dimension_numbers<[1], [0], [0], [1], [0, 0, 1, 1], [], []>} : vector<2x8xf32>, vector<8x2xf32>, vector<2x2xf32> -> vector<2x2xf32>
    %c0_6 = arith.constant 0 : index
    %c0_7 = arith.constant 0 : index
    %11 = vector.load %arg3[%c0_6, %c0_7] : memref<1x2xf32, #tpu.memory_space<vmem>>, vector<1x2xf32>
    %12 = vector.broadcast %11 : vector<1x2xf32> to vector<2x2xf32>
    %13 = arith.addf %10, %12 : vector<2x2xf32>
    %cst_8 = arith.constant 0.000000e+00 : f32
    %14 = vector.broadcast %cst_8 : f32 to vector<2x2xf32>
    %15 = arith.maximumf %13, %14 : vector<2x2xf32>
    %c0_9 = arith.constant 0 : index
    %c0_10 = arith.constant 0 : index
    %16 = vector.load %arg4[%c0_9, %c0_10] : memref<2x8xf32, #tpu.memory_space<vmem>>, vector<2x8xf32>
    %cst_11 = arith.constant dense<0.000000e+00> : vector<2x8xf32>
    %17 = tpu.matmul %15, %16, %cst_11 {dimension_numbers = #tpu.dot_dimension_numbers<[1], [0], [0], [1], [0, 0, 1, 1], [], []>} : vector<2x2xf32>, vector<2x8xf32>, vector<2x8xf32> -> vector<2x8xf32>
    %c0_12 = arith.constant 0 : index
    %c0_13 = arith.constant 0 : index
    %18 = vector.load %arg5[%c0_12, %c0_13] : memref<1x8xf32, #tpu.memory_space<vmem>>, vector<1x8xf32>
    %19 = vector.broadcast %18 : vector<1x8xf32> to vector<2x8xf32>
    %20 = arith.addf %17, %19 : vector<2x8xf32>
    %cst_14 = arith.constant 3.000000e+00 : f32
    %21 = vector.broadcast %cst_14 : f32 to vector<2x8xf32>
    %22 = arith.addf %20, %21 : vector<2x8xf32>
    %cst_15 = arith.constant 0.000000e+00 : f32
    %cst_16 = arith.constant 6.000000e+00 : f32
    %23 = vector.broadcast %cst_15 : f32 to vector<2x8xf32>
    %24 = arith.maximumf %23, %22 : vector<2x8xf32>
    %25 = vector.broadcast %cst_16 : f32 to vector<2x8xf32>
    %26 = arith.minimumf %25, %24 : vector<2x8xf32>
    %cst_17 = arith.constant 0.166666672 : f32
    %27 = vector.broadcast %cst_17 : f32 to vector<2x8xf32>
    %28 = arith.mulf %26, %27 : vector<2x8xf32>
    %29 = vector.shape_cast %28 : vector<2x8xf32> to vector<2x8x1xf32>
    %c0_i32_18 = arith.constant 0 : i32
    %c256_i32_19 = arith.constant 256 : i32
    %30 = arith.muli %c0_i32_18, %c256_i32_19 : i32
    %31 = tpu.assume_multiple %30, 128 : i32
    %c0_20 = arith.constant 0 : index
    %c0_21 = arith.constant 0 : index
    %32 = arith.index_cast %31 : i32 to index
    %33 = vector.load %arg1[%c0_20, %c0_21, %32] : memref<2x8x256xf32, #tpu.memory_space<vmem>>, vector<2x8x256xf32>
    %34 = vector.broadcast %29 : vector<2x8x1xf32> to vector<2x8x256xf32>
    %35 = arith.mulf %33, %34 : vector<2x8x256xf32>
    %c0_22 = arith.constant 0 : index
    %c0_23 = arith.constant 0 : index
    %36 = arith.index_cast %31 : i32 to index
    %37 = vector.load %arg6[%c0_22, %c0_23, %36] : memref<2x8x256xf32, #tpu.memory_space<vmem>>, vector<2x8x256xf32>
    tpu.vector_store %arg6[%c0_22, %c0_23, %36], %35 {strides = array<i32>} : memref<2x8x256xf32, #tpu.memory_space<vmem>>, vector<2x8x256xf32>,
    %c1_i32_24 = arith.constant 1 : i32
    return
  }
  func.func @transform_0(%arg0: i32) -> (i32, i32, i32) {
    %c0_i32 = arith.constant 0 : i32
    %c0_i32_0 = arith.constant 0 : i32
    %c0_i32_1 = arith.constant 0 : i32
    return %arg0, %c0_i32, %c0_i32_0 : i32, i32, i32
  }
  func.func @transform_1(%arg0: i32) -> (i32, i32) {
    %c0_i32 = arith.constant 0 : i32
    %c0_i32_0 = arith.constant 0 : i32
    %c0_i32_1 = arith.constant 0 : i32
    return %c0_i32, %c0_i32_0 : i32, i32
  }
  func.func @transform_2(%arg0: i32) -> (i32, i32) {
    %c0_i32 = arith.constant 0 : i32
    %c0_i32_0 = arith.constant 0 : i32
    %c0_i32_1 = arith.constant 0 : i32
    return %c0_i32, %c0_i32_0 : i32, i32
  }
  func.func @transform_3(%arg0: i32) -> (i32, i32) {
    %c0_i32 = arith.constant 0 : i32
    %c0_i32_0 = arith.constant 0 : i32
    %c0_i32_1 = arith.constant 0 : i32
    return %c0_i32, %c0_i32_0 : i32, i32
  }
  func.func @transform_4(%arg0: i32) -> (i32, i32) {
    %c0_i32 = arith.constant 0 : i32
    %c0_i32_0 = arith.constant 0 : i32
    %c0_i32_1 = arith.constant 0 : i32
    return %c0_i32, %c0_i32_0 : i32, i32
  }
  func.func @transform_5(%arg0: i32) -> (i32, i32, i32) {
    %c0_i32 = arith.constant 0 : i32
    %c0_i32_0 = arith.constant 0 : i32
    %c0_i32_1 = arith.constant 0 : i32
    return %arg0, %c0_i32, %c0_i32_0 : i32, i32, i32
  }
}

</mosaic_0001>

<bundles_post_ra>
// kernel: se_module.1
= control target key start
LH: loop header
LB: loop body
LE: loop exit
PB: predicated region body
PF: predicated region fallthrough
CT: control target
= control target key end

     0   :  { %v267_v6 = vmov 0.0   ;;  %vm268_vm0 = vmmov 0   ;;  %v44_v8 = vlaneseq  ;;  %vm54_vm1 = vcmask 1041409   ;;  %s339_s0 = inlined_call_operand.vmem [shape: f32[2,8,256], index: 0, kind: input, shape index: {}, may-alias: {0,5}]   ;;  %s340_s1 = inlined_call_operand.vmem [shape: f32[8,2], index: 1, kind: input, shape index: {}]   ;;  %s341_s3 = inlined_call_operand.vmem [shape: f32[2,8], index: 3, kind: input, shape index: {}]   ;;  %s342_s2 = inlined_call_operand.vmem [shape: f32[1,2], index: 2, kind: input, shape index: {}]   ;;  %s343_s4 = inlined_call_operand.vmem [shape: f32[1,8], index: 4, kind: input, shape index: {}]   ;;  %s344_s5 = inlined_call_operand.vmem [shape: f32[2,8,256], index: 5, kind: output, shape index: {}, may-alias: {0,5}]  }
   0x1   :  { %v20_v0 = vld [vmem:[%s339_s0] sm:$0xff]  ;;  %v21_v1 = vld [vmem:[%s339_s0 + $0x8] sm:$0xff]  ;;  %v308_v2 = vld [vmem:[%s339_s0 + $0x10] sm:$0xff]  ;;  %255 = vmatprep.subr.mxu0 %v267_v6  ;;  %257 = vmatprep.mubr.msk.f32.mxu0 %vm268_vm0, %v267_v6  ;;  %vm56_vm2 = vcmask 64512   ;;  %vm142_vm3 = vcmask 1041408   ;;  %vm138_vm4 = vcmask 15360  }
   0x2   :  { %v24_v3 = vadd.f32 %v21_v1, %v20_v0  ;;  %v23_v4 = vld [vmem:[%s339_s0 + $0x18] sm:$0xff]  ;;  %v34_v7 = vld [vmem:[%s340_s1] sm:$0xff]  ;;  %260 = vmatprep.subr.mxu1 %v267_v6  ;;  %262 = vmatprep.mubr.msk.f32.mxu1 %vm268_vm0, %v267_v6  ;;  %v45_v9 = vand.u32 127, %v44_v8  ;;  %v47_v10 = vshrl.u32 %v44_v8, 7 }
   0x3   :  { %v27_v5 = vadd.f32 %v23_v4, %v308_v2  ;;  %256 = vmatpush3.msra.mxu0 %v34_v7  ;;  %v130_v19 = vld [vmem:[%s341_s3] sm:$0x3] }
   0x4   :  { %25 = vadd.xlane.f32.xlu0 %v24_v3  ;;  %v48_v12 = vsub.s32 %v45_v9, %v47_v10  ;;  %261 = vmatpush3.msk.msra.mxu1 %vm142_vm3, %v130_v19  ;;  %v246_v20 = vld [vmem:[%s342_s2] ss:$0 sm:$0xff]  ;;  %v222_v32 = vsub.s32 0, %v47_v10  ;;  %v229_v35 = vsub.s32 1, %v47_v10 }
   0x5   :  { %v248_v25 = vld [vmem:[%s343_s4] ss:$0 sm:$0xff] }
   0x8   :  { %28 = vadd.xlane.f32.xlu0 %v27_v5 }
  0x8d   :  { %v26_v11 = vpop.xlane.xlu0 %25 }
  0x8e   :  { %v32_v13 = vmul.f32 0.00390625, %v26_v11 }
  0x90   :  { %v49_v16 = vrot.slane %v32_v13, %v48_v12 }
  0x91   :  { %v29_v14 = vpop.xlane.xlu0 %28 }
  0x92   :  { %v33_v15 = vmul.f32 0.00390625, %v29_v14 }
  0x94   :  { %v53_v17 = vrot.slane %v33_v15, %v48_v12 }
  0x96   :  { %v55_v18 = vsel %vm54_vm1, %v53_v17, %v49_v16 }
  0x97   :  { %258 = vmatmul.mubr.msk.f32.vlgmr.msra.gmra.mxu0 %vm56_vm2, %v55_v18 }
 0x157   :  { %v125_v21 = vpop.f32.mrf.mxu0 }
 0x158   :  { %v126_v22 = vadd.f32 %v246_v20, %v125_v21 }
 0x159   :  { %v259_v23 = vpop.f32.mrf.mxu0 }
 0x15a   :  { %v129_v24 = vmax.f32 %v126_v22, 0.0 }
 0x15c   :  { %263 = vmatmul.mubr.msk.f32.vlgmr.msra.gmra.mxu1 %vm138_vm4, %v129_v24 }
 0x21c   :  { %v212_v26 = vpop.f32.mrf.mxu1 }
 0x21d   :  { %v213_v27 = vadd.f32 %v248_v25, %v212_v26 }
 0x21e   :  { %v264_v28 = vpop.f32.mrf.mxu1 }
 0x21f   :  { %v216_v29 = vadd.f32 3.0, %v213_v27 }
 0x221   :  { %v217_v30 = vmax.f32 %v216_v29, 0.0 }
 0x223   :  { %v218_v31 = vmin.f32 %v217_v30, 6.0 }
 0x225   :  { %v219_v33 = vmul.f32 0.16666667, %v218_v31 }
 0x227   :  { %v223_v34 = vrot.slane %v219_v33, %v222_v32  ;;  %v230_v36 = vrot.slane %v219_v33, %v229_v35 }
 0x229   :  { %225 = vbcast.lane.b32.xlu1 %v223_v34, 256 }
 0x22d   :  { %232 = vbcast.lane.b32.xlu1 %v230_v36, 256 }
 0x29b   :  { %v226_v37 = vpop.permute.xlu1 %225 }
 0x29c   :  { %v234_v38 = vmul.f32 %v226_v37, %v20_v0  ;;  %v235_v39 = vmul.f32 %v226_v37, %v21_v1 }
 0x29e   :  { %238 = vst [vmem:[%s344_s5] sm:$0xff] %v234_v38  ;;  %239 = vst [vmem:[%s344_s5 + $0x8] sm:$0xff] %v235_v39 }
 0x29f   :  { %v233_v40 = vpop.permute.xlu1 %232 }
 0x2a0   :  { %v236_v41 = vmul.f32 %v233_v40, %v308_v2  ;;  %v237_v42 = vmul.f32 %v233_v40, %v23_v4 }
 0x2a2   :  { %240 = vst [vmem:[%s344_s5 + $0x10] sm:$0xff] %v236_v41  ;;  %241 = vst [vmem:[%s344_s5 + $0x18] sm:$0xff] %v237_v42 }

</bundles_post_ra>
